<compile_context>
chip_gen: v7x
topology: tpu7x:2x2x1
jax: 0.10.0
libtpu: 0.0.40
codegen_flags: <defaults>
</compile_context>

<pallas_src>
import jax
import jax.numpy as jnp
from jax import lax
from jax.experimental import pallas as pl
from jax.experimental.pallas import tpu as pltpu


# ---------------------------------------------------------------------------
# generation-aware sizing helpers
# ---------------------------------------------------------------------------
def _vmem_capacity_bytes():
    """Physical VMEM of the current chip; conservative (v7x) fallback."""
    try:
        info = pltpu.get_tpu_info()
        for attr in ("vmem_capacity_bytes", "vmem_bytes", "vmem_size_bytes"):
            v = getattr(info, attr, None)
            if v:
                return int(v)
    except Exception:
        pass
    return 64 << 20  # v7x per-TC VMEM — safe lower bound


def _pick_token_tile(n, want):
    """Largest multiple of 8 <= want that divides n (avoids pad+slice);
    if n is small, round n up to a multiple of 8."""
    want = max(8, (want // 8) * 8)
    if n <= want:
        return ((n + 7) // 8) * 8
    for t in range(want, 7, -8):
        if n % t == 0:
            return t
    return want  # nothing divides: wrapper pads (rare)


def _pick_d_tile(dsz, vsz, itemsize, budget_bytes):
    """Table column tile sized from a VMEM budget (single-buffered table block)."""
    if vsz * dsz * itemsize <= budget_bytes:
        return dsz
    max_td = (budget_bytes // (vsz * itemsize)) // 128 * 128
    max_td = int(min(max(128, max_td), dsz))
    # prefer a multiple of 128 that divides dsz (no ragged last column block)
    for cand in range(max_td - (max_td % 128), 127, -128):
        if dsz % cand == 0:
            return cand
    return max_td  # ragged last block handled by cdiv grid


# ---------------------------------------------------------------------------
# Path A (small vocab): one-hot @ table on the MXU, d-outer grid
# ---------------------------------------------------------------------------
def _onehot_matmul_kernel(idx_ref, tbl_ref, out_ref):
    # idx_ref: (t_tile, 1) int32   tbl_ref: (vsz, td)   out_ref: (t_tile, td)
    idx = idx_ref[...]                                              # (t_tile, 1)
    t_tile = idx.shape[0]
    vsz = tbl_ref.shape[0]
    col = lax.broadcasted_iota(jnp.int32, (t_tile, vsz), 1)         # (t_tile, vsz)
    onehot = (idx == col).astype(tbl_ref.dtype)                     # exact 0/1 rows
    out_ref[...] = jnp.dot(
        onehot, tbl_ref[...], preferred_element_type=jnp.float32
    ).astype(out_ref.dtype)


def _embed_onehot(flat_ids, table, *, t_tile, usable_vmem):
    n_pad = flat_ids.shape[0]
    vsz, dsz = table.shape
    itemsize = table.dtype.itemsize
    idx2 = flat_ids.reshape(n_pad, 1)

    tbl_budget = max(4 << 20, int(usable_vmem * 0.6))
    td = _pick_d_tile(dsz, vsz, itemsize, tbl_budget)
    grid_m = n_pad // t_tile
    grid_d = pl.cdiv(dsz, td)

    vmem_need = (vsz * td * itemsize              # table block (single-buffered)
                 + 2 * t_tile * 4                 # idx blocks (double-buffered)
                 + 2 * t_tile * td * itemsize     # out blocks (double-buffered)
                 + 2 * t_tile * vsz * 4           # one-hot + matmul staging
                 + (2 << 20))                     # slack
    vmem_limit = int(min(max(vmem_need, 32 << 20), usable_vmem))

    return pl.pallas_call(
        _onehot_matmul_kernel,
        out_shape=jax.ShapeDtypeStruct((n_pad, dsz), table.dtype),
        grid_spec=pltpu.PrefetchScalarGridSpec(
            num_scalar_prefetch=0,
            # d OUTER, tokens INNER: table column slice stays VMEM-resident
            # across all token tiles (no per-token-tile table re-DMA).
            grid=(grid_d, grid_m),
            in_specs=[
                pl.BlockSpec((t_tile, 1), lambda j, i: (i, 0)),     # token ids tile
                pl.BlockSpec((vsz, td), lambda j, i: (0, j),        # table col slice
                             pipeline_mode=pl.Buffered(1)),         # single-buffer
            ],
            out_specs=pl.BlockSpec((t_tile, td), lambda j, i: (i, j)),
        ),
        compiler_params=pltpu.CompilerParams(
            dimension_semantics=("parallel", "parallel"),
            vmem_limit_bytes=vmem_limit,
        ),
    )(idx2, table)


# ---------------------------------------------------------------------------
# Path B (large vocab): scalar-prefetched DMA row gather, table stays in HBM
# ---------------------------------------------------------------------------
def _gather_kernel(ids_ref, tbl_hbm, out_ref, sem):
    # ids_ref: (n_pad,) int32 in SMEM (scalar prefetch)
    # tbl_hbm: (vsz, dsz) raw HBM ref     out_ref: (t_tile, dsz) VMEM block
    i = pl.program_id(0)
    t_tile = out_ref.shape[0]
    base = i * t_tile

    def _issue(t, carry):
        row = ids_ref[base + t]
        # DMA one embedding row straight into the output VMEM block.
        pltpu.make_async_copy(tbl_hbm.at[row], out_ref.at[t], sem).start()
        return carry

    lax.fori_loop(0, t_tile, _issue, 0)

    def _drain(t, carry):
        # matched-size wait descriptor: one wait per issued row copy
        pltpu.make_async_copy(tbl_hbm.at[0], out_ref.at[0], sem).wait()
        return carry

    lax.fori_loop(0, t_tile, _drain, 0)


def _embed_gather(flat_ids, table, *, t_tile, usable_vmem):
    n_pad = flat_ids.shape[0]
    vsz, dsz = table.shape
    itemsize = table.dtype.itemsize
    grid_m = n_pad // t_tile

    vmem_need = 2 * t_tile * dsz * itemsize + (2 << 20)   # double-buffered out block
    vmem_limit = int(min(max(vmem_need, 32 << 20), usable_vmem))

    return pl.pallas_call(
        _gather_kernel,
        out_shape=jax.ShapeDtypeStruct((n_pad, dsz), table.dtype),
        grid_spec=pltpu.PrefetchScalarGridSpec(
            num_scalar_prefetch=1,                         # flat ids -> SMEM
            grid=(grid_m,),
            in_specs=[pl.BlockSpec(memory_space=pl.ANY)],  # table stays in HBM
            out_specs=pl.BlockSpec((t_tile, dsz), lambda i, ids: (i, 0)),
            scratch_shapes=[pltpu.SemaphoreType.DMA],
        ),
        compiler_params=pltpu.CompilerParams(
            dimension_semantics=("parallel",),
            vmem_limit_bytes=vmem_limit,
        ),
    )(flat_ids, table)


# ---------------------------------------------------------------------------
# wrapper == LookupTableEmbeddings.forward(x) == nn.Embedding(x)
# ---------------------------------------------------------------------------
def lookup_table_embeddings(ids, table, *, token_tile=256, gather_vocab_threshold=1024):
    """ids: int array [B, T]; table: float array [vsz, dsz] -> [B, T, dsz]."""
    B, T = ids.shape
    vsz, dsz = table.shape
    n = B * T
    flat = ids.reshape(n).astype(jnp.int32)
    itemsize = table.dtype.itemsize

    cap = _vmem_capacity_bytes()
    usable = max(16 << 20, cap - (16 << 20))   # headroom for Mosaic internals

    use_gather = vsz > gather_vocab_threshold

    want = token_tile
    if use_gather:
        # keep the double-buffered (t_tile, dsz) output block well inside VMEM
        max_rows = (usable // 4) // max(1, dsz * itemsize)
        want = min(want, max(8, (int(max_rows) // 8) * 8))

    t_tile = _pick_token_tile(n, want)
    n_pad = pl.cdiv(n, t_tile) * t_tile
    if n_pad != n:
        flat = jnp.pad(flat, (0, n_pad - n))   # pad ids = 0 (valid padding row)

    if use_gather:
        out = _embed_gather(flat, table, t_tile=t_tile, usable_vmem=usable)
    else:
        out = _embed_onehot(flat, table, t_tile=t_tile, usable_vmem=usable)

    if n_pad != n:
        out = out[:n]
    return out.reshape(B, T, dsz)


def make_embedding_table(key, vsz, dsz):
    """Init matching nn.Embedding(vsz, dsz, padding_idx=0): N(0,1), row 0 zeroed."""
    w = jax.random.normal(key, (vsz, dsz), dtype=jnp.float32)
    w = w.at[0].set(0.0)
    return w


if __name__ == "__main__":
    key = jax.random.PRNGKey(0)
    k_w, k_ids, k_w2, k_ids2 = jax.random.split(key, 4)

    # --- Path A demo: small shapes from the module (B=2, T=8, vsz=64, dsz=32) ---
    B, T, VSZ, DSZ = 2, 8, 64, 32
    table = make_embedding_table(k_w, VSZ, DSZ)
    ids = jax.random.randint(k_ids, (B, T), minval=0, maxval=VSZ, dtype=jnp.int32)
    ids = ids.at[0, 0].set(0)  # exercise padding_idx row
    out = jax.block_until_ready(lookup_table_embeddings(ids, table))
    ref = jnp.take(table, ids, axis=0)
    assert out.shape == (B, T, DSZ)
    assert jnp.allclose(out, ref, atol=1e-6), "one-hot path mismatch vs gather ref"

    # --- Path B demo: larger vocab exercises the DMA row-gather kernel ---
    B2, T2, VSZ2, DSZ2 = 2, 64, 2048, 128
    table2 = make_embedding_table(k_w2, VSZ2, DSZ2)
    ids2 = jax.random.randint(k_ids2, (B2, T2), minval=0, maxval=VSZ2, dtype=jnp.int32)
    ids2 = ids2.at[0, 0].set(0)
    out2 = jax.block_until_ready(lookup_table_embeddings(ids2, table2))
    ref2 = jnp.take(table2, ids2, axis=0)
    assert out2.shape == (B2, T2, DSZ2)
    assert jnp.allclose(out2, ref2, atol=1e-6), "gather path mismatch vs gather ref"

    print("KERNEL_OK")
</pallas_src>

<mosaic_0001>
module attributes {stable_mosaic.version = 11 : i64} {
  func.func @_onehot_matmul_kernel(%arg0: i32, %arg1: i32, %arg2: memref<16x1xi32, #tpu.memory_space<vmem>>, %arg3: memref<64x32xf32, #tpu.memory_space<vmem>>, %arg4: memref<16x32xf32, #tpu.memory_space<vmem>>) attributes {dimension_semantics = [#tpu.dimension_semantics<parallel>, #tpu.dimension_semantics<parallel>], iteration_bounds = array<i64: 1, 1>, scalar_prefetch = 0 : i64, scratch_operands = 0 : i64, tpu.core_type = #tpu.core_type<tc>, window_params = [{transform_indices = @transform_0, window_bounds = array<i64: 16, 1>}, {pipeline_mode = #tpu.pipeline_mode<synchronous>, transform_indices = @transform_1, window_bounds = array<i64: 64, 32>}, {transform_indices = @transform_2, window_bounds = array<i64: 16, 32>}]} {
    %c0 = arith.constant 0 : index
    %c0_0 = arith.constant 0 : index
    %0 = vector.load %arg2[%c0, %c0_0] : memref<16x1xi32, #tpu.memory_space<vmem>>, vector<16x1xi32>
    %1 = tpu.iota {dimensions = array<i32: 1>} : vector<16x64xi32>
    %2 = vector.broadcast %0 : vector<16x1xi32> to vector<16x64xi32>
    %3 = arith.cmpi eq, %2, %1 : vector<16x64xi32>
    %4 = arith.extui %3 : vector<16x64xi1> to vector<16x64xi32>
    %5 = arith.sitofp %4 : vector<16x64xi32> to vector<16x64xf32>
    %c0_1 = arith.constant 0 : index
    %c0_2 = arith.constant 0 : index
    %6 = vector.load %arg3[%c0_1, %c0_2] : memref<64x32xf32, #tpu.memory_space<vmem>>, vector<64x32xf32>
    %cst = arith.constant dense<0.000000e+00> : vector<16x32xf32>
    %7 = tpu.matmul %5, %6, %cst {dimension_numbers = #tpu.dot_dimension_numbers<[1], [0], [0], [1], [0, 0, 1, 1], [], []>} : vector<16x64xf32>, vector<64x32xf32>, vector<16x32xf32> -> vector<16x32xf32>
    %c0_3 = arith.constant 0 : index
    %c0_4 = arith.constant 0 : index
    %8 = vector.load %arg4[%c0_3, %c0_4] : memref<16x32xf32, #tpu.memory_space<vmem>>, vector<16x32xf32>
    tpu.vector_store %arg4[%c0_3, %c0_4], %7 {strides = array<i32>} : memref<16x32xf32, #tpu.memory_space<vmem>>, vector<16x32xf32>,
    return
  }
  func.func @transform_0(%arg0: i32, %arg1: i32) -> (i32, i32) {
    %c0_i32 = arith.constant 0 : i32
    %c0_i32_0 = arith.constant 0 : i32
    return %arg1, %c0_i32 : i32, i32
  }
  func.func @transform_1(%arg0: i32, %arg1: i32) -> (i32, i32) {
    %c0_i32 = arith.constant 0 : i32
    %c0_i32_0 = arith.constant 0 : i32
    return %c0_i32, %arg0 : i32, i32
  }
  func.func @transform_2(%arg0: i32, %arg1: i32) -> (i32, i32) {
    %c0_i32 = arith.constant 0 : i32
    return %arg1, %arg0 : i32, i32
  }
}

</mosaic_0001>

<bundles_post_ra>
// kernel: tpu_custom_call.1
= control target key start
LH: loop header
LB: loop body
LE: loop exit
PB: predicated region body
PF: predicated region fallthrough
CT: control target
= control target key end

     0   :  { %v216_v2 = vmov 0   ;;  %s278_s0 = inlined_call_operand.vmem [shape: s32[16,1], index: 0, kind: input, shape index: {}]   ;;  %s279_s1 = inlined_call_operand.vmem [shape: f32[64,32], index: 1, kind: input, shape index: {}]   ;;  %s280_s2 = inlined_call_operand.hbm [shape: f32[16,32], index: 2, kind: output, shape index: {}]  }
   0x1   :  { %v12_v0 = vld [vmem:[%s278_s0] sm:$0xff]  ;;  %191 = vset.pattern.permute.xlu0 %v216_v2  ;;  %v29_v3 = vld [vmem:[%s279_s1 + $0x8] sm:$0xff]  ;;  %v30_v4 = vld [vmem:[%s279_s1 + $0x10] sm:$0xff] }
   0x2   :  { %v28_v1 = vld [vmem:[%s279_s1] sm:$0xff]  ;;  %v31_v5 = vld [vmem:[%s279_s1 + $0x18] sm:$0xff]  ;;  %17 = vperm.xlu0 %191, %v12_v0   ;;  %v13_v6 = vld [vmem:[%s278_s0 + $0x8] sm:$0xff] }
   0x3   :  { %v170_v7 = vpack.c.bf16 %v29_v3, %v28_v1  ;;  %v174_v8 = vpack.c.bf16 %v31_v5, %v30_v4  ;;  %v32_v9 = vld [vmem:[%s279_s1 + $0x20] sm:$0xff]  ;;  %v33_v10 = vld [vmem:[%s279_s1 + $0x28] sm:$0xff] }
   0x4   :  { %7 = vsyncpa [#allocation3], 0  ;;  %v178_v11 = vpack.c.bf16 %v33_v10, %v32_v9  ;;  %v34_v12 = vld [vmem:[%s279_s1 + $0x30] sm:$0xff]  ;;  %v35_v13 = vld [vmem:[%s279_s1 + $0x38] sm:$0xff]  ;;  %v14_v15 = vlaneseq  ;;  %vm36_vm0 = vcmask 523264   ;;  %v217_v18 = vmov 0.0  }
   0x5   :  { %171 = vmatprep.subr.bf16.mxu0 %v170_v7  ;;  %v182_v14 = vpack.c.bf16 %v35_v13, %v34_v12  ;;  %s218_s28 = smov [#allocation2]   ;;  %vm118_vm3 = vcmask 261120  }
   0x6   :  { %173 = vmatpush3.bf16.msra.mxu0 %v170_v7  ;;  %20 = vperm.xlu0 %191, %v13_v6   ;;  %v15_v16 = vand.u32 127, %v14_v15  ;;  %s126_s1 = sshll.u32 %s218_s28, 4  ;;  %s127_s1 = int_to_ptr.vmem [resolvable:$true] %s126_s1 }
   0x7   :  { %175 = vmatprep.subr.bf16.mxu0 %v174_v8  ;;  %s192_s29 = scalar_lea.vmem %s127_s1, 256  ;;  %p197_p1 = scmp.lt.s32.totalorder %s127_s1, %s127_s1 }
   0x8   :  { %p193_p0 = scmp.ne.s32.totalorder %s127_s1, %s192_s29  ;;  %p198_p2 = scmp.lt.s32.totalorder %s192_s29, %s192_s29 }
   0xa   :  { %177 = vmatpush3.bf16.msra.mxu0 %v174_v8  ;;  %p199_p3 = por %p198_p2, %p197_p1 }
   0xb   :  { %179 = vmatprep.subr.bf16.mxu0 %v178_v11 }
   0xc   :  { %p200_p4 = pnand %p199_p3, %p193_p0 }
   0xe   :  { %181 = vmatpush3.bf16.msra.mxu0 %v178_v11 }
   0xf   :  { %183 = vmatprep.subr.bf16.mxu0 %v182_v14 }
  0x12   :  { %185 = vmatpush3.bf16.msra.mxu0 %v182_v14 }
  0x81   :  { %v18_v17 = vpop.permute.xlu0 %17 }
  0x82   :  { %vm22_vm1 = vcmp.eq.s32.totalorder %v18_v17, %v15_v16 }
  0x83   :  { %v137_v19 = vsel %vm22_vm1, 1.0, %v217_v18 }
  0x84   :  { %167 = vmatprep.mubr.msk.f32.mxu0 %vm36_vm0, %v137_v19 }
  0x85   :  { %v21_v20 = vpop.permute.xlu0 %20 }
  0x86   :  { %vm23_vm2 = vcmp.eq.s32.totalorder %v21_v20, %v15_v16 }
  0x87   :  { %v138_v21 = vsel %vm23_vm2, 1.0, %v217_v18 }
  0x88   :  { %168 = vmatmul.mubr.msk.f32.vlgmr.msra.gmra.mrb[0].mxu0 %vm36_vm0, %v138_v21 }
 0x15b   :  { %v169_v22 = vpop.f32.mrb[0].mxu0 }
 0x15c   :  { %120 = vst.msk [vmem:[#allocation2 + $0x8] sm:$0xff] %vm118_vm3, %v169_v22  ;;  %v109_v23 = vpop.f32.mrb[1].mxu0 }
 0x15d   :  { %119 = vst.msk [vmem:[#allocation2] sm:$0xff] %vm118_vm3, %v109_v23 }
 0x15e   :  { %203 = shalt.err (!%p200_p4)
}
 0x15f   :  { %s204_s4 = scalar_lea.hbm %s280_s2, 256 }
 0x160   :  { %p205_p5 = scmp.ne.s32.totalorder %s280_s2, %s204_s4  ;;  %p208_p6 = scmp.lt.u32.totalorder %s204_s4, %s280_s2 }
 0x162   :  { %p210_p7 = pnand %p208_p6, %p205_p5 }
 0x164   :  { %213 = shalt.err (!%p210_p7)
}
 0x165   :  { %s219_s9 = smov 128   ;;  %s220_s10 = smov 8  }
 0x166   :  { %132 = dma.vmem_to_hbm [thread:$0]  %s127_s1, 256, %s280_s2, [#allocation3], %s219_s9, %s219_s9, %s220_s10  }
 0x167   :  { %214 = dma.done.wait [#allocation3], 256  }
 0x168   :  { %215 = vsyncadd [#allocation3], 4294967040 }
 0x169   :  { %136 = vsyncpa [#allocation3], 1 }

</bundles_post_ra>
